<compile_context>
chip_gen: v5e
topology: v5e:2x2
jax: 0.10.0
libtpu: 0.0.40
codegen_flags: <defaults>
</compile_context>

<pallas_src>
import jax
import jax.numpy as jnp
from jax.experimental import pallas as pl
from jax.experimental.pallas import tpu as pltpu


def _attention_kernel(x_ref, wqkv_ref, wp_ref, bp_ref, o_ref):
    D = wp_ref.shape[0]                        # static

    x = x_ref[...]                             # (tb, Cp) f32 (kept for residual)
    xb = x.astype(jnp.bfloat16)                # bf16 only feeds the MXU

    # Fused q/k/v projection: one MXU matmul; weight stays resident across grid.
    qkv = jnp.dot(xb, wqkv_ref[...],
                  preferred_element_type=jnp.float32)          # (tb, 3D) f32
    q = qkv[:, 0 * D:1 * D]                    # (tb, D)
    k = qkv[:, 1 * D:2 * D]                    # (tb, D)
    v = qkv[:, 2 * D:3 * D]                    # (tb, D)

    # attn[b,i,j] = q[b,i] * k[b,j] * scale ; scale = 1 ** -0.5 = 1.0
    # NOTE: the (tb, D, D) score tile is lane-sparse (D=8 of 128 lanes, ~tb/8
    # vregs); fine at small tb.  Flatten to a lane-dense (tb, D*D) layout
    # before raising tb to MXU/HBM-roofline-filling sizes.
    s = q[:, :, None] * k[:, None, :]                          # (tb, D, D)

    # Numerically-stable softmax; normalization applied AFTER the v-reduction
    # so the 1/denominator multiply touches (tb, D), not (tb, D, D).
    s = s - jnp.max(s, axis=-1, keepdims=True)
    p = jnp.exp(s)                                             # (tb, D, D)
    den = jnp.sum(p, axis=-1)                                  # (tb, D)
    num = jnp.sum(p * v[:, None, :], axis=-1)                  # (tb, D)
    o = num * pl.reciprocal(den, approx=True)                  # (tb, D) f32
    # attn_drop(p=0.0) and proj_drop(p=0.0) are identities.

    # Output projection (bf16 MXU inputs, f32 accumulate) + bias + residual.
    out = jnp.dot(o.astype(jnp.bfloat16), wp_ref[...],
                  preferred_element_type=jnp.float32)          # (tb, Cp)
    o_ref[...] = (out + bp_ref[...] + x).astype(o_ref.dtype)


def make_attention_forward(wq, wkv, wp, bp):
    """One-time setup (hoisted out of the call path per review).

    wq: (D, C)   q Linear weight, PyTorch (out, in) layout
    wkv: (2D, C) kv Linear weight
    wp: (C, D)   proj Linear weight
    bp: (C,)     proj bias
    Returns a jitted forward(x) for x:(B, C) f32.
    """
    D, C = wq.shape

    # The PyTorch reshape(B, D, 2, 1).permute(2, 0, 1, 3) interleaves the kv
    # Linear's out-features: k = even rows, v = odd rows.
    wk = wkv[0::2, :]
    wv = wkv[1::2, :]

    # Pre-transpose to (in, out) and fuse q/k/v into one (C, 3D) RHS.
    wqkv_t = jnp.concatenate([wq.T, wk.T, wv.T], axis=1)        # (C, 3D)
    wp_t = wp.T                                                 # (D, C)

    # Lane-dense padding of the channel axis (multiple of 128), done ONCE.
    Cp = ((C + 127) // 128) * 128
    pad = Cp - C
    if pad:
        wqkv_t = jnp.pad(wqkv_t, ((0, pad), (0, 0)))   # extra input rows = 0
        wp_t = jnp.pad(wp_t, ((0, 0), (0, pad)))       # extra output cols = 0
        bp = jnp.pad(bp, ((0, pad),))

    # bf16 MXU inputs (halves resident-weight bytes; accumulation stays f32).
    wqkv_b = jnp.asarray(wqkv_t, dtype=jnp.bfloat16)
    wp_b = jnp.asarray(wp_t, dtype=jnp.bfloat16)
    bp2 = jnp.asarray(bp, dtype=jnp.float32).reshape(1, Cp)

    @jax.jit
    def forward(x):
        B, C_in = x.shape
        assert C_in == C, "channel mismatch vs. setup weights"

        # Single grid step for small B: per-step fixed overhead (~0.35 us)
        # dominates KB-scale tiles and there is nothing to double-buffer.
        # Only tile + megacore-split when each step carries hundreds of rows.
        # TODO(synk): flatten the (tb, D, D) score to a lane-dense layout
        # before raising tb past ~64-256 (vreg spill otherwise).
        tb = B if B <= 256 else 256
        Bp = ((B + tb - 1) // tb) * tb
        grid = (Bp // tb,)
        multi_step = grid[0] > 1

        x_p = x
        if pad or Bp != B:
            x_p = jnp.pad(x, ((0, Bp - B), (0, pad)))

        out_p = pl.pallas_call(
            _attention_kernel,
            out_shape=jax.ShapeDtypeStruct((Bp, Cp), x.dtype),
            grid_spec=pltpu.PrefetchScalarGridSpec(
                num_scalar_prefetch=0,
                grid=grid,
                in_specs=[
                    pl.BlockSpec((tb, Cp), lambda i: (i, 0)),      # x tile
                    pl.BlockSpec((Cp, 3 * D), lambda i: (0, 0)),   # fused qkv W (resident)
                    pl.BlockSpec((D, Cp), lambda i: (0, 0)),       # proj W (resident)
                    pl.BlockSpec((1, Cp), lambda i: (0, 0)),       # proj bias
                ],
                out_specs=pl.BlockSpec((tb, Cp), lambda i: (i, 0)),
            ),
            compiler_params=pltpu.CompilerParams(
                dimension_semantics=(
                    ("parallel",) if multi_step else ("arbitrary",))),
        )(x_p, wqkv_b, wp_b, bp2)

        out = out_p
        if Bp != B:
            out = out[:B]
        if pad:
            out = out[:, :C]
        return out

    return forward


def attention_reference(x, wq, wkv, wp, bp):
    """Pure-JAX f32 reference mirroring the PyTorch forward op-for-op."""
    B, C = x.shape
    D = wq.shape[0]
    q = x @ wq.T                                          # (B, D)
    kv = (x @ wkv.T).reshape(B, D, 2, 1)
    kv = jnp.transpose(kv, (2, 0, 1, 3))                  # (2, B, D, 1)
    k, v = kv[0][..., 0], kv[1][..., 0]                   # (B, D) each
    scale = 1.0                                           # 1 ** (-0.5)
    attn = q[:, :, None] * k[:, None, :] * scale          # (B, D, D)
    attn = jax.nn.softmax(attn, axis=-1)
    o = jnp.einsum("bij,bj->bi", attn, v)                 # (B, D)
    return o @ wp.T + bp + x


if __name__ == "__main__":
    # Module config (synthetic, deterministic init — no checkpoint load).
    B = 16            # batch
    dim = 32          # C
    ratio = 4
    D = dim // ratio  # 8

    key = jax.random.PRNGKey(0)
    kx, kq, kkv, kp = jax.random.split(key, 4)

    # PyTorch-layout weights: (out_features, in_features), std=0.02
    # (trunc_normal_ approximated by plain normal — negligible at std=0.02).
    wq = 0.02 * jax.random.normal(kq, (D, dim), dtype=jnp.float32)
    wkv = 0.02 * jax.random.normal(kkv, (2 * D, dim), dtype=jnp.float32)
    wp = 0.02 * jax.random.normal(kp, (dim, D), dtype=jnp.float32)
    bp = jnp.zeros((dim,), dtype=jnp.float32)      # proj bias initialized to 0

    x = jax.random.normal(kx, (B, dim), dtype=jnp.float32)

    # One-time weight prep (fusion / padding / bf16 cast), then the fast path.
    forward = make_attention_forward(wq, wkv, wp, bp)
    out = jax.block_until_ready(forward(x))

    ref = attention_reference(x, wq, wkv, wp, bp)
    assert out.shape == (B, dim)
    # Tolerance covers bf16 MXU inputs + approx reciprocal (both
    # review-sanctioned); observed error is ~1e-4 vs the f32 reference.
    assert jnp.allclose(out, ref, atol=1e-3, rtol=1e-3), "mismatch vs reference"

    print("KERNEL_OK")
</pallas_src>

<mosaic_0001>
module attributes {stable_mosaic.version = 11 : i64} {
  func.func @_attention_kernel(%arg0: i32, %arg1: memref<16x128xf32, #tpu.memory_space<vmem>>, %arg2: memref<128x24xbf16, #tpu.memory_space<vmem>>, %arg3: memref<8x128xbf16, #tpu.memory_space<vmem>>, %arg4: memref<1x128xf32, #tpu.memory_space<vmem>>, %arg5: memref<16x128xf32, #tpu.memory_space<vmem>>) attributes {dimension_semantics = [#tpu.dimension_semantics<arbitrary>], iteration_bounds = array<i64: 1>, scalar_prefetch = 0 : i64, scratch_operands = 0 : i64, tpu.core_type = #tpu.core_type<tc>, window_params = [{transform_indices = @transform_0, window_bounds = array<i64: 16, 128>}, {pipeline_mode = #tpu.pipeline_mode<synchronous>, transform_indices = @transform_1, window_bounds = array<i64: 128, 24>}, {pipeline_mode = #tpu.pipeline_mode<synchronous>, transform_indices = @transform_2, window_bounds = array<i64: 8, 128>}, {pipeline_mode = #tpu.pipeline_mode<synchronous>, transform_indices = @transform_3, window_bounds = array<i64: 1, 128>}, {transform_indices = @transform_4, window_bounds = array<i64: 16, 128>}]} {
    %c0 = arith.constant 0 : index
    %c0_0 = arith.constant 0 : index
    %0 = vector.load %arg1[%c0, %c0_0] : memref<16x128xf32, #tpu.memory_space<vmem>>, vector<16x128xf32>
    %1 = arith.truncf %0 : vector<16x128xf32> to vector<16x128xbf16>
    %c0_1 = arith.constant 0 : index
    %c0_2 = arith.constant 0 : index
    %2 = vector.load %arg2[%c0_1, %c0_2] : memref<128x24xbf16, #tpu.memory_space<vmem>>, vector<128x24xbf16>
    %cst = arith.constant dense<0.000000e+00> : vector<16x24xf32>
    %3 = tpu.matmul %1, %2, %cst {dimension_numbers = #tpu.dot_dimension_numbers<[1], [0], [0], [1], [0, 0, 1, 1], [], []>} : vector<16x128xbf16>, vector<128x24xbf16>, vector<16x24xf32> -> vector<16x24xf32>
    %4 = vector.extract_strided_slice %3 {offsets = [0, 0], sizes = [16, 8], strides = [1, 1]} : vector<16x24xf32> to vector<16x8xf32>
    %5 = vector.extract_strided_slice %3 {offsets = [0, 8], sizes = [16, 8], strides = [1, 1]} : vector<16x24xf32> to vector<16x8xf32>
    %6 = vector.extract_strided_slice %3 {offsets = [0, 16], sizes = [16, 8], strides = [1, 1]} : vector<16x24xf32> to vector<16x8xf32>
    %7 = vector.shape_cast %4 : vector<16x8xf32> to vector<16x8x1xf32>
    %8 = vector.shape_cast %5 : vector<16x8xf32> to vector<16x1x8xf32>
    %9 = vector.broadcast %7 : vector<16x8x1xf32> to vector<16x8x8xf32>
    %10 = vector.broadcast %8 : vector<16x1x8xf32> to vector<16x8x8xf32>
    %11 = arith.mulf %9, %10 : vector<16x8x8xf32>
    %cst_3 = arith.constant dense<0xFF800000> : vector<16x8xf32>
    %12 = vector.multi_reduction <maximumf>, %11, %cst_3 [2] : vector<16x8x8xf32> to vector<16x8xf32>
    %13 = vector.shape_cast %12 : vector<16x8xf32> to vector<16x8x1xf32>
    %14 = vector.broadcast %13 : vector<16x8x1xf32> to vector<16x8x8xf32>
    %15 = arith.subf %11, %14 : vector<16x8x8xf32>
    %16 = math.exp %15 : vector<16x8x8xf32>
    %cst_4 = arith.constant dense<0.000000e+00> : vector<16x8xf32>
    %17 = vector.multi_reduction <add>, %16, %cst_4 [2] : vector<16x8x8xf32> to vector<16x8xf32>
    %18 = vector.shape_cast %6 : vector<16x8xf32> to vector<16x1x8xf32>
    %19 = vector.broadcast %18 : vector<16x1x8xf32> to vector<16x8x8xf32>
    %20 = arith.mulf %16, %19 : vector<16x8x8xf32>
    %cst_5 = arith.constant dense<0.000000e+00> : vector<16x8xf32>
    %21 = vector.multi_reduction <add>, %20, %cst_5 [2] : vector<16x8x8xf32> to vector<16x8xf32>
    %22 = tpu.reciprocal %17 {approx = true} : vector<16x8xf32> -> vector<16x8xf32>
    %23 = arith.mulf %21, %22 : vector<16x8xf32>
    %24 = arith.truncf %23 : vector<16x8xf32> to vector<16x8xbf16>
    %c0_6 = arith.constant 0 : index
    %c0_7 = arith.constant 0 : index
    %25 = vector.load %arg3[%c0_6, %c0_7] : memref<8x128xbf16, #tpu.memory_space<vmem>>, vector<8x128xbf16>
    %cst_8 = arith.constant dense<0.000000e+00> : vector<16x128xf32>
    %26 = tpu.matmul %24, %25, %cst_8 {dimension_numbers = #tpu.dot_dimension_numbers<[1], [0], [0], [1], [0, 0, 1, 1], [], []>} : vector<16x8xbf16>, vector<8x128xbf16>, vector<16x128xf32> -> vector<16x128xf32>
    %c0_9 = arith.constant 0 : index
    %c0_10 = arith.constant 0 : index
    %27 = vector.load %arg4[%c0_9, %c0_10] : memref<1x128xf32, #tpu.memory_space<vmem>>, vector<1x128xf32>
    %28 = vector.broadcast %27 : vector<1x128xf32> to vector<16x128xf32>
    %29 = arith.addf %26, %28 : vector<16x128xf32>
    %30 = arith.addf %29, %0 : vector<16x128xf32>
    %c0_11 = arith.constant 0 : index
    %c0_12 = arith.constant 0 : index
    %31 = vector.load %arg5[%c0_11, %c0_12] : memref<16x128xf32, #tpu.memory_space<vmem>>, vector<16x128xf32>
    tpu.vector_store %arg5[%c0_11, %c0_12], %30 {strides = array<i32>} : memref<16x128xf32, #tpu.memory_space<vmem>>, vector<16x128xf32>,
    return
  }
  func.func @transform_0(%arg0: i32) -> (i32, i32) {
    %c0_i32 = arith.constant 0 : i32
    %c0_i32_0 = arith.constant 0 : i32
    return %arg0, %c0_i32 : i32, i32
  }
  func.func @transform_1(%arg0: i32) -> (i32, i32) {
    %c0_i32 = arith.constant 0 : i32
    %c0_i32_0 = arith.constant 0 : i32
    %c0_i32_1 = arith.constant 0 : i32
    return %c0_i32, %c0_i32_0 : i32, i32
  }
  func.func @transform_2(%arg0: i32) -> (i32, i32) {
    %c0_i32 = arith.constant 0 : i32
    %c0_i32_0 = arith.constant 0 : i32
    %c0_i32_1 = arith.constant 0 : i32
    return %c0_i32, %c0_i32_0 : i32, i32
  }
  func.func @transform_3(%arg0: i32) -> (i32, i32) {
    %c0_i32 = arith.constant 0 : i32
    %c0_i32_0 = arith.constant 0 : i32
    %c0_i32_1 = arith.constant 0 : i32
    return %c0_i32, %c0_i32_0 : i32, i32
  }
  func.func @transform_4(%arg0: i32) -> (i32, i32) {
    %c0_i32 = arith.constant 0 : i32
    %c0_i32_0 = arith.constant 0 : i32
    return %arg0, %c0_i32 : i32, i32
  }
}

</mosaic_0001>

<bundles_post_ra>
// kernel: forward.1
= control target key start
LH: loop header
LB: loop body
LE: loop exit
PB: predicated region body
PF: predicated region fallthrough
CT: control target
= control target key end

     0   :  { %9 = vsyncpa [#allocation3], 0  ;;  %s1374_s0 = inlined_call_operand.vmem [shape: f32[16,128], index: 0, kind: input, shape index: {}]   ;;  %s1375_s1 = inlined_call_operand.hbm [shape: bf16[128,24], index: 1, kind: input, shape index: {}]   ;;  %s1376_s2 = inlined_call_operand.vmem [shape: bf16[8,128], index: 2, kind: input, shape index: {}]   ;;  %s1377_s3 = inlined_call_operand.vmem [shape: f32[1,128], index: 3, kind: input, shape index: {}]   ;;  %s1378_s4 = inlined_call_operand.hbm [shape: f32[16,128], index: 4, kind: output, shape index: {}]  }
   0x1   :  { %10 = vsyncpa [#allocation4], 0  ;;  %s17_s17 = sshll.u32 %s1375_s1, 4  ;;  %s1017_s18 = smov [#allocation2]   ;;  %s18_s17 = int_to_ptr.hbm [resolvable:$true] %s17_s17 }
   0x2   :  { %s19_s19 = sshll.u32 %s1017_s18, 4  ;;  %s1018_s20 = smov 64   ;;  %s20_s19 = int_to_ptr.vmem [resolvable:$true] %s19_s19 }
   0x3   :  { %s1019_s21 = smov 4  }
   0x4   :  { %25 = dma.hbm_to_vmem [thread:$0]  %s18_s17, 1024, %s20_s19, [#allocation3], %s1018_s20, %s1018_s20, %s1019_s21  }
   0x5   :  { %1013 = dma.done.wait [#allocation3], 1024  }
   0x6   :  { %1014 = vsyncadd [#allocation3], 4294966272  ;;  %v887_v0 = vld [vmem:[#allocation2 + $0x38] sm:$0xff]  ;;  %v117_v1 = vlaneseq  ;;  %v886_v2 = vld [vmem:[#allocation2 + $0x30] sm:$0xff]  ;;  %s1020_s25 = smov 120   ;;  %vm292_vm0 = vcmask 130112  }
   0x7   :  { %102 = vmatpush.bf16.msra.mxu0 %v887_v0  ;;  %v885_v4 = vld [vmem:[#allocation2 + $0x28] sm:$0xff]  ;;  %v884_v5 = vld [vmem:[#allocation2 + $0x20] sm:$0xff]  ;;  %v883_v6 = vld [vmem:[#allocation2 + $0x18] sm:$0xff]  ;;  %vm453_vm1 = vcmask 64512   ;;  %vm781_vm2 = vcmask 1041409   ;;  %vm783_vm3 = vcmask 1042434  }
   0x8   :  { %v118_v3 = vshrl.u32 %v117_v1, 7  ;;  %v882_v7 = vld [vmem:[#allocation2 + $0x10] sm:$0xff]  ;;  %v881_v8 = vld [vmem:[#allocation2 + $0x8] sm:$0xff]  ;;  %v880_v9 = vld [vmem:[#allocation2] sm:$0xff]  ;;  %vm785_vm4 = vcmask 1043459   ;;  %vm787_vm5 = vcmask 1044484  }
   0x9   :  { %v35_v10 = vld [vmem:[%s1374_s0] sm:$0xff]  ;;  %v36_v11 = vld [vmem:[%s1374_s0 + $0x8] sm:$0xff]  ;;  %vm789_vm6 = vcmask 1045509   ;;  %vm791_vm7 = vcmask 1046534   ;;  %vm806_vm8 = vcmask 1043456   ;;  %vm793_vm9 = vcmask 1047559  }
   0xa   :  { %897 = vset.pattern.permute.xlu2 %v118_v3  ;;  %896 = vset.pattern.permute.xlu1 %v118_v3  ;;  %v37_v12 = vpack.c.bf16 %v36_v11, %v35_v10  ;;  %s1021_s5 = smov [#allocation5]   ;;  %s834_s9 = sshll.u32 %s1378_s4, 4  ;;  %s835_s9 = int_to_ptr.hbm [resolvable:$true] %s834_s9 }
   0xb   :  { %103 = vmatpush.bf16.msra.mxu0 %v886_v2  ;;  %895 = vset.pattern.permute.xlu0 %v118_v3  ;;  %s832_s6 = sshll.u32 %s1021_s5, 4  ;;  %s1022_s11 = smov 128   ;;  %s833_s6 = int_to_ptr.vmem [resolvable:$true] %s832_s6 }
   0xc   :  { %s1023_s12 = smov 8  }
   0xf   :  { %104 = vmatpush.bf16.msra.mxu0 %v885_v4 }
  0x13   :  { %105 = vmatpush.bf16.msra.mxu0 %v884_v5 }
  0x17   :  { %106 = vmatpush.bf16.msra.mxu0 %v883_v6 }
  0x1b   :  { %107 = vmatpush.bf16.msra.mxu0 %v882_v7 }
  0x1f   :  { %108 = vmatpush.bf16.msra.mxu0 %v881_v8 }
  0x23   :  { %109 = vmatpush.bf16.msra.mxu0 %v880_v9 }
  0x26   :  { %110 = vmatmul.bf16.vlgmr.msra.gmra.mxu0 %v37_v12 }
  0xa3   :  { %v111_v13 = vpop.f32.mrf.mxu0 }
  0xa4   :  { %v144_v14 = vperm.slane %v111_v13, 4  ;;  %v130_v15 = vperm.slane %v111_v13, 2  ;;  %v1059_v16 = vperm.slane %v111_v13, 0  ;;  %v151_v17 = vperm.slane %v111_v13, 5 }
  0xa5   :  { %v137_v18 = vperm.slane %v111_v13, 3  ;;  %v123_v19 = vperm.slane %v111_v13, 1  ;;  %v230_v20 = vrot.slane %v111_v13, 1  ;;  %v165_v22 = vperm.slane %v111_v13, 7 }
  0xa6   :  { %149 = vperm.xlu2 %897, %v144_v14   ;;  %135 = vperm.xlu1 %896, %v130_v15   ;;  %v158_v23 = vperm.slane %v111_v13, 6  ;;  %v233_v24 = vrot.slane %v111_v13, 4  ;;  %v231_v25 = vrot.slane %v111_v13, 2  ;;  %v236_v28 = vrot.slane %v111_v13, 7 }
  0xa7   :  { %121 = vperm.xlu0 %895, %v1059_v16   ;;  %v1062_v21 = vperm.slane %v230_v20, 0  ;;  %v232_v29 = vrot.slane %v111_v13, 3  ;;  %v234_v30 = vrot.slane %v111_v13, 5  ;;  %v235_v34 = vrot.slane %v111_v13, 6 }
  0xa8   :  { %v1066_v26 = vperm.slane %v233_v24, 0  ;;  %v246_v27 = vperm.slane %v231_v25, 0  ;;  %v1073_v31 = vperm.slane %v236_v28, 0 }
  0xa9   :  { %v1075_v32 = vperm.slane %v232_v29, 0  ;;  %v1077_v33 = vperm.slane %v234_v30, 0  ;;  %v1085_v36 = vperm.slane %v235_v34, 0 }
  0xab   :  { %v113_v35 = vpop.f32.mrf.mxu0 }
  0xac   :  { %v1087_v37 = vperm.slane %v113_v35, 0  ;;  %v179_v38 = vperm.slane %v113_v35, 1  ;;  %v186_v39 = vperm.slane %v113_v35, 2  ;;  %v193_v40 = vperm.slane %v113_v35, 3 }
  0xad   :  { %v200_v41 = vperm.slane %v113_v35, 4  ;;  %v207_v42 = vperm.slane %v113_v35, 5  ;;  %v214_v43 = vperm.slane %v113_v35, 6  ;;  %v221_v44 = vperm.slane %v113_v35, 7 }
  0xae   :  { %156 = vperm.xlu2 %897, %v151_v17   ;;  %142 = vperm.xlu1 %896, %v137_v18   ;;  %v237_v45 = vrot.slane %v113_v35, 1  ;;  %v238_v46 = vrot.slane %v113_v35, 2  ;;  %v240_v49 = vrot.slane %v113_v35, 4  ;;  %v241_v50 = vrot.slane %v113_v35, 5 }
  0xaf   :  { %128 = vperm.xlu0 %895, %v123_v19   ;;  %v239_v51 = vrot.slane %v113_v35, 3  ;;  %v243_v55 = vrot.slane %v113_v35, 7  ;;  %v242_v56 = vrot.slane %v113_v35, 6 }
  0xb0   :  { %v1092_v47 = vperm.slane %v237_v45, 0  ;;  %v1094_v48 = vperm.slane %v238_v46, 0  ;;  %v1102_v52 = vperm.slane %v240_v49, 0  ;;  %v1104_v53 = vperm.slane %v241_v50, 0 }
  0xb1   :  { %v255_v54 = vperm.slane %v239_v51, 0  ;;  %v1111_v57 = vperm.slane %v243_v55, 0  ;;  %v258_v58 = vperm.slane %v242_v56, 0 }
  0xb6   :  { %504 = vrot.lane.b32.xlu2 %v1062_v21, %s1020_s25  ;;  %170 = vperm.xlu1 %896, %v165_v22  }
  0xb7   :  { %163 = vperm.xlu0 %895, %v158_v23  }
  0xbe   :  { %510 = vrot.lane.b32.xlu2 %v1066_v26, %s1020_s25  ;;  %502 = vrot.lane.b32.xlu1 %v1059_v16, %s1020_s25 }
  0xbf   :  { %506 = vrot.lane.b32.xlu0 %v246_v27, %s1020_s25 }
  0xc6   :  { %516 = vrot.lane.b32.xlu2 %v1073_v31, %s1020_s25  ;;  %508 = vrot.lane.b32.xlu1 %v1075_v32, %s1020_s25 }
  0xc7   :  { %512 = vrot.lane.b32.xlu0 %v1077_v33, %s1020_s25 }
  0xce   :  { %514 = vrot.lane.b32.xlu1 %v1085_v36, %s1020_s25  ;;  %177 = vperm.xlu2 %897, %v1087_v37  }
  0xcf   :  { %184 = vperm.xlu0 %895, %v179_v38  }
  0xd6   :  { %191 = vperm.xlu1 %896, %v186_v39   ;;  %198 = vperm.xlu2 %897, %v193_v40  }
  0xd7   :  { %205 = vperm.xlu0 %895, %v200_v41  }
  0xde   :  { %212 = vperm.xlu1 %896, %v207_v42   ;;  %219 = vperm.xlu2 %897, %v214_v43  }
  0xdf   :  { %226 = vperm.xlu0 %895, %v221_v44  }
  0xe6   :  { %520 = vrot.lane.b32.xlu1 %v1092_v47, %s1020_s25  ;;  %522 = vrot.lane.b32.xlu2 %v1094_v48, %s1020_s25 }
  0xe7   :  { %518 = vrot.lane.b32.xlu0 %v1087_v37, %s1020_s25 }
  0xee   :  { %526 = vrot.lane.b32.xlu1 %v1102_v52, %s1020_s25  ;;  %528 = vrot.lane.b32.xlu2 %v1104_v53, %s1020_s25 }
  0xef   :  { %524 = vrot.lane.b32.xlu0 %v255_v54, %s1020_s25 }
  0xf6   :  { %532 = vrot.lane.b32.xlu1 %v1111_v57, %s1020_s25 }
  0xf7   :  { %530 = vrot.lane.b32.xlu0 %v258_v58, %s1020_s25 }
 0x100   :  { %v150_v59 = vpop.permute.xlu2 %149 }
 0x101   :  { %v1133_v9 = vmul.f32 %v1066_v26, %v150_v59 }
 0x103   :  { %v305_v12 = vsel %vm292_vm0, %v1133_v9, -inf }
 0x108   :  { %v157_v60 = vpop.permute.xlu2 %156 }
 0x110   :  { %v1116_v61 = vpop.permute.xlu2 %504 }
 0x118   :  { %v136_v62 = vpop.permute.xlu1 %135  ;;  %v1123_v3 = vpop.permute.xlu2 %510 }
 0x119   :  { %v122_v63 = vpop.permute.xlu0 %121  ;;  %v1121_v2 = vmul.f32 %v246_v27, %v136_v62 }
 0x11a   :  { %v1119_v0 = vmul.f32 %v122_v63, %v1059_v16 }
 0x11b   :  { %v299_v6 = vsel %vm292_vm0, %v1121_v2, -inf }
 0x11c   :  { %v293_v4 = vsel %vm292_vm0, %v1119_v0, -inf }
 0x120   :  { %v143_v5 = vpop.permute.xlu1 %142  ;;  %294 = vmax.xlane.f32.xlu1 %v293_v4  ;;  %v1137_v11 = vpop.permute.xlu2 %516 }
 0x121   :  { %v129_v7 = vpop.permute.xlu0 %128  ;;  %300 = vmax.xlane.f32.xlu0 %v299_v6  ;;  %v1142_v13 = vmul.f32 %v1075_v32, %v143_v5 }
 0x122   :  { %v1130_v8 = vmul.f32 %v1062_v21, %v129_v7  ;;  %v1157_v21 = vmul.f32 %v1077_v33, %v157_v60 }
 0x123   :  { %v302_v19 = vsel %vm292_vm0, %v1142_v13, -inf }
 0x124   :  { %v296_v10 = vsel %vm292_vm0, %v1130_v8, -inf  ;;  %v308_v25 = vsel %vm292_vm0, %v1157_v21, -inf }
 0x125   :  { %297 = vmax.xlane.f32.xlu2 %v296_v10 }
 0x128   :  { %v171_v14 = vpop.permute.xlu1 %170  ;;  %306 = vmax.xlane.f32.xlu1 %v305_v12  ;;  %v178_v23 = vpop.permute.xlu2 %177 }
 0x129   :  { %v164_v15 = vpop.permute.xlu0 %163  ;;  %v1148_v17 = vmul.f32 %v1073_v31, %v171_v14  ;;  %v1166_v26 = vmul.f32 %v178_v23, %v1087_v37 }
 0x12a   :  { %v1145_v16 = vmul.f32 %v1085_v36, %v164_v15 }
 0x12b   :  { %v314_v20 = vsel %vm292_vm0, %v1148_v17, -inf  ;;  %v317_v30 = vsel %vm292_vm0, %v1166_v26, -inf }
 0x12c   :  { %v311_v18 = vsel %vm292_vm0, %v1145_v16, -inf }
 0x12d   :  { %312 = vmax.xlane.f32.xlu0 %v311_v18  ;;  %303 = vmax.xlane.f32.xlu2 %v302_v19 }
 0x130   :  { %v1159_v22 = vpop.permute.xlu1 %502  ;;  %315 = vmax.xlane.f32.xlu1 %v314_v20  ;;  %v199_v29 = vpop.permute.xlu2 %198 }
 0x131   :  { %v1161_v24 = vpop.permute.xlu0 %506  ;;  %v1174_v31 = vmul.f32 %v255_v54, %v199_v29 }
 0x133   :  { %v326_v36 = vsel %vm292_vm0, %v1174_v31, -inf }
 0x135   :  { %309 = vmax.xlane.f32.xlu2 %v308_v25 }
 0x138   :  { %v1168_v27 = vpop.permute.xlu1 %508  ;;  %v220_v37 = vpop.permute.xlu2 %219 }
 0x139   :  { %v1170_v28 = vpop.permute.xlu0 %512  ;;  %v1185_v38 = vmul.f32 %v258_v58, %v220_v37 }
 0x13b   :  { %v335_v45 = vsel %vm292_vm0, %v1185_v38, -inf }
 0x13d   :  { %318 = vmax.xlane.f32.xlu2 %v317_v30 }
 0x140   :  { %v1176_v32 = vpop.permute.xlu1 %514 }
 0x141   :  { %v185_v33 = vpop.permute.xlu0 %184 }
 0x142   :  { %v1179_v34 = vmul.f32 %v1092_v47, %v185_v33 }
 0x144   :  { %v320_v35 = vsel %vm292_vm0, %v1179_v34, -inf }
 0x145   :  { %321 = vmax.xlane.f32.xlu0 %v320_v35  ;;  %327 = vmax.xlane.f32.xlu2 %v326_v36 }
 0x148   :  { %v192_v39 = vpop.permute.xlu1 %191 }
 0x149   :  { %v1188_v40 = vmul.f32 %v1094_v48, %v192_v39  ;;  %v206_v41 = vpop.permute.xlu0 %205 }
 0x14a   :  { %v1191_v42 = vmul.f32 %v1102_v52, %v206_v41 }
 0x14b   :  { %v323_v43 = vsel %vm292_vm0, %v1188_v40, -inf }
 0x14c   :  { %324 = vmax.xlane.f32.xlu1 %v323_v43  ;;  %v329_v44 = vsel %vm292_vm0, %v1191_v42, -inf }
 0x14d   :  { %330 = vmax.xlane.f32.xlu0 %v329_v44  ;;  %336 = vmax.xlane.f32.xlu2 %v335_v45 }
 0x150   :  { %v213_v46 = vpop.permute.xlu1 %212 }
 0x151   :  { %v1200_v47 = vmul.f32 %v1104_v53, %v213_v46  ;;  %v227_v48 = vpop.permute.xlu0 %226  ;;  %v1215_v53 = vpop.permute.xlu2 %522 }
 0x152   :  { %v1203_v49 = vmul.f32 %v1111_v57, %v227_v48 }
 0x153   :  { %v332_v50 = vsel %vm292_vm0, %v1200_v47, -inf }
 0x154   :  { %333 = vmax.xlane.f32.xlu1 %v332_v50  ;;  %v338_v51 = vsel %vm292_vm0, %v1203_v49, -inf }
 0x155   :  { %339 = vmax.xlane.f32.xlu0 %v338_v51 }
 0x158   :  { %v1209_v52 = vpop.permute.xlu1 %520 }
 0x159   :  { %v1211_v54 = vpop.permute.xlu0 %518  ;;  %v1221_v58 = vpop.permute.xlu2 %528 }
 0x160   :  { %v1213_v55 = vpop.permute.xlu1 %526 }
 0x161   :  { %v1217_v56 = vpop.permute.xlu0 %524 }
 0x168   :  { %v1219_v57 = vpop.permute.xlu1 %532 }
 0x169   :  { %v1223_v59 = vpop.permute.xlu0 %530 }
 0x193   :  { %v295_v60 = vpop.xlane.xlu1 %294 }
 0x194   :  { %v341_v62 = vsub.f32 %v1119_v0, %v295_v60  ;;  %v301_v6 = vpop.xlane.xlu0 %300 }
 0x195   :  { %v343_v14 = vsub.f32 %v1121_v2, %v301_v6 }
 0x196   :  { %v357_v63 = vmul.f32 1.442695, %v341_v62 }
 0x197   :  { %v361_v0 = vmul.f32 1.442695, %v343_v14 }
 0x198   :  { %899 = vpow2.f32 %v357_v63  ;;  %v298_v4 = vpop.xlane.xlu2 %297 }
 0x199   :  { %v342_v5 = vsub.f32 %v1130_v8, %v298_v4 }
 0x19b   :  { %v359_v7 = vmul.f32 1.442695, %v342_v5  ;;  %v307_v10 = vpop.xlane.xlu1 %306 }
 0x19c   :  { %v345_v12 = vsub.f32 %v1133_v9, %v307_v10 }
 0x19d   :  { %901 = vpow2.f32 %v359_v7 }
 0x19e   :  { %v900_v15 = vpop.eup %899  ;;  %v365_v18 = vmul.f32 1.442695, %v345_v12 }
 0x19f   :  { %405 = vrot.lane.b32.xlu0 %v900_v15, %s1020_s25  ;;  %v550_v46 = vmul.f32 %v900_v15, %v1159_v22 }
 0x1a0   :  { %903 = vpow2.f32 %v365_v18  ;;  %v304_v19 = vpop.xlane.xlu2 %303  ;;  %v313_v25 = vpop.xlane.xlu0 %312 }
 0x1a1   :  { %v344_v20 = vsub.f32 %v1142_v13, %v304_v19  ;;  %905 = vpow2.f32 %v361_v0  ;;  %v347_v9 = vsub.f32 %v1145_v16, %v313_v25 }
 0x1a3   :  { %v902_v23 = vpop.eup %901  ;;  %v363_v8 = vmul.f32 1.442695, %v344_v20  ;;  %v316_v29 = vpop.xlane.xlu1 %315  ;;  %v369_v36 = vmul.f32 1.442695, %v347_v9 }
 0x1a4   :  { %v348_v30 = vsub.f32 %v1148_v17, %v316_v29  ;;  %407 = vrot.lane.b32.xlu2 %v902_v23, %s1020_s25 }
 0x1a5   :  { %907 = vpow2.f32 %v363_v8 }
 0x1a6   :  { %v904_v2 = vpop.eup %903  ;;  %v371_v33 = vmul.f32 1.442695, %v348_v30 }
 0x1a7   :  { %413 = vrot.lane.b32.xlu1 %v904_v2, %s1020_s25  ;;  %v906_v37 = vpop.eup %905  ;;  %v554_v48 = vmul.f32 %v904_v2, %v1123_v3 }
 0x1a8   :  { %909 = vpow2.f32 %v371_v33  ;;  %v310_v35 = vpop.xlane.xlu2 %309  ;;  %v552_v50 = vmul.f32 %v906_v37, %v1161_v24 }
 0x1a9   :  { %v346_v13 = vsub.f32 %v1157_v21, %v310_v35  ;;  %v551_v21 = vmul.f32 %v902_v23, %v1116_v61 }
 0x1ab   :  { %v367_v39 = vmul.f32 1.442695, %v346_v13  ;;  %v908_v41 = vpop.eup %907 }
 0x1ac   :  { %409 = vrot.lane.b32.xlu2 %v906_v37, %s1020_s25  ;;  %411 = vrot.lane.b32.xlu0 %v908_v41, %s1020_s25  ;;  %v553_v4 = vmul.f32 %v908_v41, %v1168_v27 }
 0x1ad   :  { %911 = vpow2.f32 %v367_v39 }
 0x1ae   :  { %v910_v17 = vpop.eup %909  ;;  %913 = vpow2.f32 %v369_v36 }
 0x1af   :  { %419 = vrot.lane.b32.xlu1 %v910_v17, %s1020_s25  ;;  %v557_v3 = vmul.f32 %v910_v17, %v1137_v11 }
 0x1b0   :  { %v319_v44 = vpop.xlane.xlu2 %318 }
 0x1b1   :  { %v349_v61 = vsub.f32 %v1166_v26, %v319_v44 }
 0x1b3   :  { %v912_v16 = vpop.eup %911  ;;  %v373_v5 = vmul.f32 1.442695, %v349_v61 }
 0x1b4   :  { %v914_v43 = vpop.eup %913  ;;  %415 = vrot.lane.b32.xlu2 %v912_v16, %s1020_s25  ;;  %v555_v24 = vmul.f32 %v912_v16, %v1170_v28 }
 0x1b5   :  { %417 = vrot.lane.b32.xlu0 %v914_v43, %s1020_s25  ;;  %v556_v10 = vmul.f32 %v914_v43, %v1176_v32 }
 0x1b7   :  { %584 = vrot.lane.b32.xlu1 %v551_v21, %s1020_s25 }
 0x1b8   :  { %v322_v45 = vpop.xlane.xlu0 %321  ;;  %v328_v60 = vpop.xlane.xlu2 %327 }
 0x1b9   :  { %v350_v51 = vsub.f32 %v1179_v34, %v322_v45  ;;  %v352_v6 = vsub.f32 %v1174_v31, %v328_v60 }
 0x1bb   :  { %v375_v63 = vmul.f32 1.442695, %v350_v51  ;;  %v379_v34 = vmul.f32 1.442695, %v352_v6 }
 0x1bc   :  { %582 = vrot.lane.b32.xlu2 %v550_v46, %s1020_s25 }
 0x1bd   :  { %590 = vrot.lane.b32.xlu0 %v554_v48, %s1020_s25  ;;  %915 = vpow2.f32 %v375_v63 }
 0x1be   :  { %917 = vpow2.f32 %v373_v5 }
 0x1bf   :  { %586 = vrot.lane.b32.xlu1 %v552_v50, %s1020_s25  ;;  %v325_v22 = vpop.xlane.xlu1 %324  ;;  %919 = vpow2.f32 %v379_v34 }
 0x1c0   :  { %v331_v62 = vpop.xlane.xlu0 %330  ;;  %v351_v27 = vsub.f32 %v1188_v40, %v325_v22  ;;  %v337_v11 = vpop.xlane.xlu2 %336 }
 0x1c1   :  { %v353_v26 = vsub.f32 %v1191_v42, %v331_v62  ;;  %v355_v28 = vsub.f32 %v1185_v38, %v337_v11 }
 0x1c2   :  { %v377_v31 = vmul.f32 1.442695, %v351_v27 }
 0x1c3   :  { %v381_v7 = vmul.f32 1.442695, %v353_v26  ;;  %v916_v14 = vpop.eup %915  ;;  %v385_v18 = vmul.f32 1.442695, %v355_v28 }
 0x1c4   :  { %588 = vrot.lane.b32.xlu2 %v553_v4, %s1020_s25  ;;  %v918_v42 = vpop.eup %917  ;;  %v559_v8 = vmul.f32 %v916_v14, %v1209_v52 }
 0x1c5   :  { %596 = vrot.lane.b32.xlu0 %v557_v3, %s1020_s25  ;;  %921 = vpow2.f32 %v381_v7  ;;  %v920_v0 = vpop.eup %919  ;;  %v558_v29 = vmul.f32 %v918_v42, %v1211_v54 }
 0x1c6   :  { %923 = vpow2.f32 %v377_v31  ;;  %v561_v30 = vmul.f32 %v920_v0, %v1217_v56 }
 0x1c7   :  { %592 = vrot.lane.b32.xlu1 %v555_v24, %s1020_s25  ;;  %v334_v15 = vpop.xlane.xlu1 %333  ;;  %925 = vpow2.f32 %v385_v18 }
 0x1c8   :  { %v340_v12 = vpop.xlane.xlu0 %339  ;;  %v354_v32 = vsub.f32 %v1200_v47, %v334_v15 }
 0x1c9   :  { %v356_v40 = vsub.f32 %v1203_v49, %v340_v12 }
 0x1ca   :  { %v383_v23 = vmul.f32 1.442695, %v354_v32 }
 0x1cb   :  { %v387_v19 = vmul.f32 1.442695, %v356_v40  ;;  %v922_v20 = vpop.eup %921 }
 0x1cc   :  { %594 = vrot.lane.b32.xlu2 %v556_v10, %s1020_s25  ;;  %v924_v38 = vpop.eup %923  ;;  %v562_v2 = vmul.f32 %v922_v20, %v1213_v55 }
 0x1cd   :  { %423 = vrot.lane.b32.xlu0 %v916_v14, %s1020_s25  ;;  %927 = vpow2.f32 %v387_v19  ;;  %v926_v49 = vpop.eup %925  ;;  %v560_v9 = vmul.f32 %v924_v38, %v1215_v53 }
 0x1ce   :  { %929 = vpow2.f32 %v383_v23  ;;  %v564_v52 = vmul.f32 %v926_v49, %v1223_v59 }
 0x1cf   :  { %421 = vrot.lane.b32.xlu1 %v918_v42, %s1020_s25 }
 0x1d3   :  { %v928_v25 = vpop.eup %927 }
 0x1d4   :  { %427 = vrot.lane.b32.xlu2 %v920_v0, %s1020_s25  ;;  %v930_v47 = vpop.eup %929  ;;  %v565_v54 = vmul.f32 %v928_v25, %v1219_v57 }
 0x1d5   :  { %429 = vrot.lane.b32.xlu0 %v922_v20, %s1020_s25  ;;  %v563_v33 = vmul.f32 %v930_v47, %v1221_v58 }
 0x1d7   :  { %425 = vrot.lane.b32.xlu1 %v924_v38, %s1020_s25 }
 0x1dc   :  { %433 = vrot.lane.b32.xlu2 %v926_v49, %s1020_s25 }
 0x1dd   :  { %435 = vrot.lane.b32.xlu0 %v928_v25, %s1020_s25 }
 0x1df   :  { %431 = vrot.lane.b32.xlu1 %v930_v47, %s1020_s25 }
 0x1e4   :  { %600 = vrot.lane.b32.xlu2 %v559_v8, %s1020_s25 }
 0x1e5   :  { %598 = vrot.lane.b32.xlu0 %v558_v29, %s1020_s25 }
 0x1e7   :  { %604 = vrot.lane.b32.xlu1 %v561_v30, %s1020_s25 }
 0x1ec   :  { %606 = vrot.lane.b32.xlu2 %v562_v2, %s1020_s25 }
 0x1ed   :  { %602 = vrot.lane.b32.xlu0 %v560_v9, %s1020_s25 }
 0x1ef   :  { %610 = vrot.lane.b32.xlu1 %v564_v52, %s1020_s25 }
 0x1f4   :  { %612 = vrot.lane.b32.xlu2 %v565_v54, %s1020_s25 }
 0x1f5   :  { %608 = vrot.lane.b32.xlu0 %v563_v33, %s1020_s25 }
 0x1fe   :  { %v408_v56 = vpop.permute.xlu2 %407 }
 0x1ff   :  { %v457_v57 = vsel %vm453_vm1, %v408_v56, 0.0 }
 0x206   :  { %v410_v55 = vpop.permute.xlu2 %409 }
 0x207   :  { %v460_v16 = vsel %vm453_vm1, %v410_v55, 0.0 }
 0x20e   :  { %v416_v36 = vpop.permute.xlu2 %415 }
 0x20f   :  { %v469_v46 = vsel %vm453_vm1, %v416_v36, 0.0 }
 0x211   :  { %v406_v35 = vpop.permute.xlu0 %405 }
 0x212   :  { %v454_v53 = vsel %vm453_vm1, %v406_v35, 0.0 }
 0x216   :  { %v583_v17 = vpop.permute.xlu2 %582 }
 0x217   :  { %v630_v62 = vsel %vm453_vm1, %v583_v17, 0.0  ;;  %v1324_v17 = vand.u32 127, %v117_v1 }
 0x219   :  { %v414_v13 = vpop.permute.xlu1 %413  ;;  %455 = vadd.xlane.f32.xlu1 %v454_v53 }
 0x21a   :  { %v466_v59 = vsel %vm453_vm1, %v414_v13, 0.0 }
 0x21d   :  { %467 = vadd.xlane.f32.xlu2 %v466_v59 }
 0x21e   :  { %v412_v37 = vpop.permute.xlu0 %411  ;;  %v589_v48 = vpop.permute.xlu2 %588 }
 0x21f   :  { %458 = vadd.xlane.f32.xlu0 %v457_v57  ;;  %v463_v58 = vsel %vm453_vm1, %v412_v37, 0.0  ;;  %v639_v5 = vsel %vm453_vm1, %v589_v48, 0.0 }
 0x221   :  { %v420_v39 = vpop.permute.xlu1 %419  ;;  %464 = vadd.xlane.f32.xlu1 %v463_v58 }
 0x222   :  { %v475_v41 = vsel %vm453_vm1, %v420_v39, 0.0 }
 0x225   :  { %476 = vadd.xlane.f32.xlu2 %v475_v41 }
 0x226   :  { %v595_v4 = vpop.permute.xlu2 %594 }
 0x227   :  { %v418_v43 = vpop.permute.xlu0 %417  ;;  %461 = vadd.xlane.f32.xlu0 %v460_v16  ;;  %v648_v7 = vsel %vm453_vm1, %v595_v4, 0.0 }
 0x228   :  { %v472_v21 = vsel %vm453_vm1, %v418_v43, 0.0 }
 0x229   :  { %v585_v44 = vpop.permute.xlu1 %584  ;;  %473 = vadd.xlane.f32.xlu1 %v472_v21 }
 0x22a   :  { %v633_v45 = vsel %vm453_vm1, %v585_v44, 0.0 }
 0x22d   :  { %634 = vadd.xlane.f32.xlu2 %v633_v45 }
 0x22e   :  { %v428_v34 = vpop.permute.xlu2 %427 }
 0x22f   :  { %v591_v50 = vpop.permute.xlu0 %590  ;;  %470 = vadd.xlane.f32.xlu0 %v469_v46  ;;  %v487_v28 = vsel %vm453_vm1, %v428_v34, 0.0 }
 0x230   :  { %v642_v51 = vsel %vm453_vm1, %v591_v50, 0.0 }
 0x231   :  { %v587_v61 = vpop.permute.xlu1 %586  ;;  %643 = vadd.xlane.f32.xlu1 %v642_v51 }
 0x232   :  { %v636_v60 = vsel %vm453_vm1, %v587_v61, 0.0 }
 0x235   :  { %637 = vadd.xlane.f32.xlu2 %v636_v60 }
 0x236   :  { %v434_v31 = vpop.permute.xlu2 %433 }
 0x237   :  { %v597_v63 = vpop.permute.xlu0 %596  ;;  %631 = vadd.xlane.f32.xlu0 %v630_v62  ;;  %v496_v18 = vsel %vm453_vm1, %v434_v31, 0.0 }
 0x238   :  { %v651_v56 = vsel %vm453_vm1, %v597_v63, 0.0 }
 0x239   :  { %v593_v22 = vpop.permute.xlu1 %592 }
 0x23a   :  { %v645_v3 = vsel %vm453_vm1, %v593_v22, 0.0 }
 0x23d   :  { %646 = vadd.xlane.f32.xlu2 %v645_v3 }
 0x23e   :  { %v601_v19 = vpop.permute.xlu2 %600 }
 0x23f   :  { %v424_v6 = vpop.permute.xlu0 %423  ;;  %640 = vadd.xlane.f32.xlu0 %v639_v5  ;;  %v657_v49 = vsel %vm453_vm1, %v601_v19, 0.0 }
 0x240   :  { %v481_v24 = vsel %vm453_vm1, %v424_v6, 0.0 }
 0x241   :  { %482 = vadd.xlane.f32.xlu1 %v481_v24  ;;  %v422_v26 = vpop.permute.xlu1 %421 }
 0x242   :  { %v478_v27 = vsel %vm453_vm1, %v422_v26, 0.0 }
 0x245   :  { %479 = vadd.xlane.f32.xlu2 %v478_v27 }
 0x246   :  { %v607_v8 = vpop.permute.xlu2 %606 }
 0x247   :  { %v430_v11 = vpop.permute.xlu0 %429  ;;  %649 = vadd.xlane.f32.xlu0 %v648_v7  ;;  %v666_v2 = vsel %vm453_vm1, %v607_v8, 0.0 }
 0x248   :  { %v490_v10 = vsel %vm453_vm1, %v430_v11, 0.0 }
 0x249   :  { %491 = vadd.xlane.f32.xlu1 %v490_v10  ;;  %v426_v12 = vpop.permute.xlu1 %425 }
 0x24a   :  { %v484_v14 = vsel %vm453_vm1, %v426_v12, 0.0 }
 0x24d   :  { %485 = vadd.xlane.f32.xlu2 %v484_v14 }
 0x24e   :  { %v613_v54 = vpop.permute.xlu2 %612 }
 0x24f   :  { %v436_v15 = vpop.permute.xlu0 %435  ;;  %488 = vadd.xlane.f32.xlu0 %v487_v28  ;;  %v675_v33 = vsel %vm453_vm1, %v613_v54, 0.0 }
 0x250   :  { %v499_v42 = vsel %vm453_vm1, %v436_v15, 0.0 }
 0x251   :  { %500 = vadd.xlane.f32.xlu1 %v499_v42  ;;  %v432_v40 = vpop.permute.xlu1 %431 }
 0x252   :  { %v493_v32 = vsel %vm453_vm1, %v432_v40, 0.0 }
 0x255   :  { %494 = vadd.xlane.f32.xlu2 %v493_v32 }
 0x257   :  { %v599_v0 = vpop.permute.xlu0 %598  ;;  %497 = vadd.xlane.f32.xlu0 %v496_v18 }
 0x258   :  { %v654_v20 = vsel %vm453_vm1, %v599_v0, 0.0 }
 0x259   :  { %655 = vadd.xlane.f32.xlu1 %v654_v20  ;;  %v605_v23 = vpop.permute.xlu1 %604 }
 0x25a   :  { %v663_v38 = vsel %vm453_vm1, %v605_v23, 0.0 }
 0x25d   :  { %664 = vadd.xlane.f32.xlu2 %v663_v38 }
 0x25f   :  { %v603_v25 = vpop.permute.xlu0 %602  ;;  %658 = vadd.xlane.f32.xlu0 %v657_v49 }
 0x260   :  { %v660_v47 = vsel %vm453_vm1, %v603_v25, 0.0 }
 0x261   :  { %661 = vadd.xlane.f32.xlu1 %v660_v47  ;;  %v611_v29 = vpop.permute.xlu1 %610 }
 0x262   :  { %v672_v30 = vsel %vm453_vm1, %v611_v29, 0.0 }
 0x265   :  { %673 = vadd.xlane.f32.xlu2 %v672_v30 }
 0x267   :  { %v609_v9 = vpop.permute.xlu0 %608  ;;  %667 = vadd.xlane.f32.xlu0 %v666_v2 }
 0x268   :  { %v669_v52 = vsel %vm453_vm1, %v609_v9, 0.0 }
 0x269   :  { %670 = vadd.xlane.f32.xlu1 %v669_v52 }
 0x26f   :  { %676 = vadd.xlane.f32.xlu0 %v675_v33 }
 0x271   :  { %652 = vadd.xlane.f32.xlu1 %v651_v56 }
 0x28c   :  { %v456_v55 = vpop.xlane.xlu1 %455 }
 0x290   :  { %v468_v35 = vpop.xlane.xlu2 %467 }
 0x292   :  { %v459_v53 = vpop.xlane.xlu0 %458 }
 0x293   :  { %931 = vrcp.f32 %v459_v53 }
 0x294   :  { %v465_v13 = vpop.xlane.xlu1 %464 }
 0x298   :  { %v1321_v59 = vpop.xlane.xlu2 %476 }
 0x299   :  { %v932_v57 = vpop.eup %931 }
 0x29a   :  { %v462_v36 = vpop.xlane.xlu0 %461 }
 0x29b   :  { %933 = vrcp.f32 %v462_v36 }
 0x29c   :  { %v474_v58 = vpop.xlane.xlu1 %473  ;;  %935 = vrcp.f32 %v456_v55 }
 0x29d   :  { %937 = vrcp.f32 %v468_v35  ;;  %v726_v35 = vld [vmem:[%s1376_s2] sm:$0xf] }
 0x2a0   :  { %v635_v37 = vpop.xlane.xlu2 %634 }
 0x2a1   :  { %v695_v39 = vmul.f32 %v932_v57, %v635_v37  ;;  %v934_v44 = vpop.eup %933 }
 0x2a2   :  { %v471_v41 = vpop.xlane.xlu0 %470  ;;  %v936_v48 = vpop.eup %935 }
 0x2a3   :  { %v711_v16 = vpack.c.bf16 %v695_v39, %v695_v39  ;;  %939 = vrcp.f32 %v471_v41  ;;  %v938_v62 = vpop.eup %937 }
 0x2a4   :  { %v644_v51 = vpop.xlane.xlu1 %643  ;;  %941 = vrcp.f32 %v465_v13  ;;  %v808_v13 = vsel %vm806_vm8, %v726_v35, 0 }
 0x2a5   :  { %v748_v43 = vunpack.c.l.b16 %v711_v16  ;;  %v698_v1 = vmul.f32 %v938_v62, %v644_v51  ;;  %943 = vrcp.f32 %v474_v58  ;;  %817 = vmatpush.bf16.msra.mxu1 %v808_v13 }
 0x2a7   :  { %v766_v21 = vperm.slane %v748_v43, %v1324_v17  ;;  %v714_v27 = vpack.c.bf16 %v698_v1, %v698_v1 }
 0x2a8   :  { %v638_v45 = vpop.xlane.xlu2 %637 }
 0x2a9   :  { %v696_v46 = vmul.f32 %v934_v44, %v638_v45  ;;  %v940_v3 = vpop.eup %939  ;;  %v751_v15 = vunpack.c.l.b16 %v714_v27 }
 0x2aa   :  { %v632_v50 = vpop.xlane.xlu0 %631  ;;  %v942_v26 = vpop.eup %941 }
 0x2ab   :  { %v712_v61 = vpack.c.bf16 %v696_v46, %v696_v46  ;;  %v694_v60 = vmul.f32 %v936_v48, %v632_v50  ;;  %v944_v19 = vpop.eup %943  ;;  %v769_v0 = vperm.slane %v751_v15, %v1324_v17 }
 0x2ad   :  { %v710_v63 = vpack.c.bf16 %v694_v60, %v694_v60  ;;  %v749_v4 = vunpack.c.l.b16 %v712_v61 }
 0x2af   :  { %v747_v22 = vunpack.c.l.b16 %v710_v63  ;;  %v767_v34 = vperm.slane %v749_v4, %v1324_v17 }
 0x2b0   :  { %v647_v5 = vpop.xlane.xlu2 %646 }
 0x2b1   :  { %v765_v6 = vperm.slane %v747_v22, %v1324_v17  ;;  %v699_v24 = vmul.f32 %v940_v3, %v647_v5 }
 0x2b2   :  { %v641_v7 = vpop.xlane.xlu0 %640 }
 0x2b3   :  { %v782_v11 = vsel %vm781_vm2, %v766_v21, %v765_v6  ;;  %v715_v10 = vpack.c.bf16 %v699_v24, %v699_v24  ;;  %v697_v12 = vmul.f32 %v942_v26, %v641_v7 }
 0x2b4   :  { %v784_v14 = vsel %vm783_vm3, %v767_v34, %v782_v11  ;;  %v483_v31 = vpop.xlane.xlu1 %482 }
 0x2b5   :  { %v713_v28 = vpack.c.bf16 %v697_v12, %v697_v12  ;;  %v752_v42 = vunpack.c.l.b16 %v715_v10 }
 0x2b7   :  { %v750_v40 = vunpack.c.l.b16 %v713_v28  ;;  %v770_v23 = vperm.slane %v752_v42, %v1324_v17 }
 0x2b8   :  { %v480_v32 = vpop.xlane.xlu2 %479 }
 0x2b9   :  { %v768_v18 = vperm.slane %v750_v40, %v1324_v17  ;;  %945 = vrcp.f32 %v480_v32 }
 0x2ba   :  { %v650_v20 = vpop.xlane.xlu0 %649  ;;  %947 = vrcp.f32 %v483_v31 }
 0x2bb   :  { %v786_v38 = vsel %vm785_vm4, %v768_v18, %v784_v14  ;;  %v700_v49 = vmul.f32 %v944_v19, %v650_v20 }
 0x2bc   :  { %v788_v25 = vsel %vm787_vm5, %v769_v0, %v786_v38  ;;  %v492_v47 = vpop.xlane.xlu1 %491 }
 0x2bd   :  { %v716_v8 = vpack.c.bf16 %v700_v49, %v700_v49  ;;  %v790_v29 = vsel %vm789_vm6, %v770_v23, %v788_v25 }
 0x2bf   :  { %v753_v30 = vunpack.c.l.b16 %v716_v8  ;;  %v946_v36 = vpop.eup %945 }
 0x2c0   :  { %v486_v2 = vpop.xlane.xlu2 %485  ;;  %v948_v58 = vpop.eup %947 }
 0x2c1   :  { %v771_v9 = vperm.slane %v753_v30, %v1324_v17  ;;  %949 = vrcp.f32 %v486_v2 }
 0x2c2   :  { %v489_v52 = vpop.xlane.xlu0 %488 }
 0x2c3   :  { %v1339_v54 = vsel %vm791_vm7, %v771_v9, %v790_v29  ;;  %951 = vrcp.f32 %v489_v52 }
 0x2c4   :  { %v501_v33 = vpop.xlane.xlu1 %500  ;;  %953 = vrcp.f32 %v492_v47 }
 0x2c7   :  { %v950_v16 = vpop.eup %949 }
 0x2c8   :  { %v495_v56 = vpop.xlane.xlu2 %494 }
 0x2c9   :  { %v952_v46 = vpop.eup %951  ;;  %955 = vrcp.f32 %v495_v56 }
 0x2ca   :  { %v498_v55 = vpop.xlane.xlu0 %497  ;;  %v954_v60 = vpop.eup %953 }
 0x2cb   :  { %957 = vrcp.f32 %v498_v55 }
 0x2cc   :  { %v656_v53 = vpop.xlane.xlu1 %655  ;;  %959 = vrcp.f32 %v501_v33 }
 0x2cd   :  { %v702_v57 = vmul.f32 %v946_v36, %v656_v53  ;;  %961 = vrcp.f32 %v1321_v59  ;;  %v898_v36 = vld [vmem:[%s1377_s3] ss:$0 sm:$0xff] }
 0x2cf   :  { %v718_v21 = vpack.c.bf16 %v702_v57, %v702_v57  ;;  %v956_v5 = vpop.eup %955 }
 0x2d0   :  { %v665_v37 = vpop.xlane.xlu2 %664 }
 0x2d1   :  { %v705_v48 = vmul.f32 %v952_v46, %v665_v37  ;;  %v755_v61 = vunpack.c.l.b16 %v718_v21  ;;  %v958_v24 = vpop.eup %957 }
 0x2d2   :  { %v659_v39 = vpop.xlane.xlu0 %658  ;;  %v960_v15 = vpop.eup %959 }
 0x2d3   :  { %v703_v41 = vmul.f32 %v948_v58, %v659_v39  ;;  %v721_v1 = vpack.c.bf16 %v705_v48, %v705_v48  ;;  %v773_v26 = vperm.slane %v755_v61, %v1324_v17  ;;  %v962_v59 = vpop.eup %961  ;;  %v963_v58 = vld [vmem:[%s1374_s0] sm:$0xff] }
 0x2d4   :  { %v662_v43 = vpop.xlane.xlu1 %661 }
 0x2d5   :  { %v719_v44 = vpack.c.bf16 %v703_v41, %v703_v41  ;;  %v704_v45 = vmul.f32 %v950_v16, %v662_v43  ;;  %v758_v10 = vunpack.c.l.b16 %v721_v1  ;;  %v964_v41 = vld [vmem:[%s1374_s0 + $0x8] sm:$0xff] }
 0x2d7   :  { %v756_v50 = vunpack.c.l.b16 %v719_v44  ;;  %v720_v51 = vpack.c.bf16 %v704_v45, %v704_v45  ;;  %v776_v19 = vperm.slane %v758_v10, %v1324_v17 }
 0x2d8   :  { %v674_v22 = vpop.xlane.xlu2 %673 }
 0x2d9   :  { %v757_v62 = vunpack.c.l.b16 %v720_v51  ;;  %v774_v4 = vperm.slane %v756_v50, %v1324_v17  ;;  %v708_v11 = vmul.f32 %v958_v24, %v674_v22 }
 0x2da   :  { %v668_v63 = vpop.xlane.xlu0 %667 }
 0x2db   :  { %v706_v3 = vmul.f32 %v954_v60, %v668_v63  ;;  %v775_v7 = vperm.slane %v757_v62, %v1324_v17  ;;  %v795_v12 = vsel %vm781_vm2, %v774_v4, %v773_v26  ;;  %v724_v40 = vpack.c.bf16 %v708_v11, %v708_v11 }
 0x2dc   :  { %v671_v6 = vpop.xlane.xlu1 %670 }
 0x2dd   :  { %v722_v27 = vpack.c.bf16 %v706_v3, %v706_v3  ;;  %v707_v34 = vmul.f32 %v956_v5, %v671_v6  ;;  %v796_v42 = vsel %vm783_vm3, %v775_v7, %v795_v12  ;;  %v761_v47 = vunpack.c.l.b16 %v724_v40 }
 0x2de   :  { %v797_v23 = vsel %vm785_vm4, %v776_v19, %v796_v42 }
 0x2df   :  { %v759_v14 = vunpack.c.l.b16 %v722_v27  ;;  %v723_v31 = vpack.c.bf16 %v707_v34, %v707_v34  ;;  %v779_v33 = vperm.slane %v761_v47, %v1324_v17 }
 0x2e1   :  { %v760_v28 = vunpack.c.l.b16 %v723_v31  ;;  %v777_v32 = vperm.slane %v759_v14, %v1324_v17 }
 0x2e2   :  { %v677_v18 = vpop.xlane.xlu0 %676 }
 0x2e3   :  { %v709_v0 = vmul.f32 %v960_v15, %v677_v18  ;;  %v778_v38 = vperm.slane %v760_v28, %v1324_v17  ;;  %v798_v8 = vsel %vm787_vm5, %v777_v32, %v797_v23 }
 0x2e4   :  { %v653_v20 = vpop.xlane.xlu1 %652 }
 0x2e5   :  { %v725_v49 = vpack.c.bf16 %v709_v0, %v709_v0  ;;  %v701_v25 = vmul.f32 %v962_v59, %v653_v20  ;;  %v799_v2 = vsel %vm789_vm6, %v778_v38, %v798_v8 }
 0x2e6   :  { %v800_v55 = vsel %vm791_vm7, %v779_v33, %v799_v2 }
 0x2e7   :  { %v762_v29 = vunpack.c.l.b16 %v725_v49  ;;  %v717_v30 = vpack.c.bf16 %v701_v25, %v701_v25 }
 0x2e9   :  { %v780_v9 = vperm.slane %v762_v29, %v1324_v17  ;;  %v754_v52 = vunpack.c.l.b16 %v717_v30 }
 0x2eb   :  { %v772_v56 = vperm.slane %v754_v52, %v1324_v17  ;;  %v801_v53 = vsel %vm793_vm9, %v780_v9, %v800_v55 }
 0x2ed   :  { %v794_v35 = vsel %vm793_vm9, %v772_v56, %v1339_v54 }
 0x2ee   :  { %v802_v13 = vpack.c.b16 %v801_v53, %v794_v35 }
 0x2f0   :  { %879 = vmatmul.msk.bf16.vlgmr.msra.gmra.mxu1 %vm453_vm1, %v802_v13 }
 0x36d   :  { %v819_v57 = vpop.f32.mrf.mxu1 }
 0x36e   :  { %v820_v37 = vadd.f32 %v898_v36, %v819_v57 }
 0x370   :  { %v824_v39 = vadd.f32 %v963_v58, %v820_v37 }
 0x372   :  { %826 = vst [vmem:[#allocation5] sm:$0xff] %v824_v39 }
 0x375   :  { %v821_v17 = vpop.f32.mrf.mxu1 }
 0x376   :  { %v822_v54 = vadd.f32 %v898_v36, %v821_v17 }
 0x378   :  { %v825_v16 = vadd.f32 %v964_v41, %v822_v54 }
 0x37a   :  { %827 = vst [vmem:[#allocation5 + $0x8] sm:$0xff] %v825_v16 }
 0x37b   :  { %840 = dma.vmem_to_hbm [thread:$0]  %s833_s6, 256, %s835_s9, [#allocation4], %s1022_s11, %s1022_s11, %s1023_s12  }
 0x37c   :  { %1015 = dma.done.wait [#allocation4], 256  }
 0x37d   :  { %1016 = vsyncadd [#allocation4], 4294967040 }
 0x37e   :  { %845 = vsyncpa [#allocation3], 1 }
 0x37f   :  { %846 = vsyncpa [#allocation4], 1 }

</bundles_post_ra>
